<compile_context>
chip_gen: v5e
topology: v5e:2x2
jax: 0.10.0
libtpu: 0.0.40
codegen_flags: <defaults>
</compile_context>

<pallas_src>
import functools

import jax
import jax.numpy as jnp
import numpy as np
from jax.experimental import pallas as pl
from jax.experimental.pallas import tpu as pltpu


def hermes_message_kernel(x_ref, p_ref, a_ref, b_ref, out_ref, z_ref, *, fr, jm):
    """One edge tile (lane-dense, edges on lanes).

    x_ref  : [J*M, tile_e]        streamed input (bf16 or f32)
    p_ref  : [F*R, tile_e]        streamed precomp (bf16 or f32)
    a_ref  : [I*N, F*R*J*M]       constant parameter glue (f32)
    b_ref  : [I*N, 1]             bias column (f32)
    out_ref: [I*N, tile_e]        output tile (f32)
    z_ref  : [F*R*J*M, tile_e]    VMEM scratch for the p (x) x outer product
    """
    x = x_ref[...].astype(jnp.float32)          # [JM, tE]
    p = p_ref[...].astype(jnp.float32)          # [FR, tE]

    # z[a*JM + jm, e] = p[a, e] * x[jm, e]  -- FR sublane-broadcast multiplies into scratch.
    for a in range(fr):
        z_ref[a * jm:(a + 1) * jm, :] = p[a:a + 1, :] * x

    # Single MXU matmul with K = FR*JM, lane-dense N = tile_e, f32 accumulation.
    out = jnp.dot(a_ref[...], z_ref[...], preferred_element_type=jnp.float32)
    out_ref[...] = out + b_ref[...]             # bias broadcast along lanes


def hermes_message_forward(inp, precomp, kernel, weight, bias, *,
                           tile_e=512, input_dtype=jnp.bfloat16):
    """JAX/Pallas equivalent of HermesMessageLayer.forward (equiv_bias=False):
        out = einsum('ejm,efr,bfnm,brij->ein', inp, precomp, kernel, weight)
        out += bias[None, :, None]
    """
    E, J, M = inp.shape
    E2, F, R = precomp.shape
    B, Fk, N, Mk = kernel.shape
    Bw, Rw, I, Jw = weight.shape
    assert E2 == E and (Fk, Mk, Bw, Rw, Jw) == (F, M, B, R, J)

    JM, FR, IN = J * M, F * R, I * N

    # Edge-independent basis/weight contraction (parameter glue; does not scale with E).
    # A2T[i*N+n, (f*R+r)*J*M + j*M + m] = sum_b kernel[b,f,n,m] * weight[b,r,i,j]
    A = jnp.einsum('bfnm,brij->frjmin', kernel, weight)
    A2T = A.reshape(FR * JM, IN).T.astype(jnp.float32)            # [IN, FR*JM]
    bias_col = jnp.repeat(bias.astype(jnp.float32), N).reshape(IN, 1)  # i-major, n-minor

    # Tile selection: lane-dense multiples of 128; pad E (no divisibility requirement).
    tile_e = max(128, (tile_e // 128) * 128)
    tile_e = min(tile_e, ((E + 127) // 128) * 128)
    n_tiles = pl.cdiv(E, tile_e)
    E_pad = n_tiles * tile_e

    # Lane-dense layout: edges on the lane (last) axis; stream in reduced precision.
    x_T = inp.reshape(E, JM).T.astype(input_dtype)                # [JM, E]
    p_T = precomp.reshape(E, FR).T.astype(input_dtype)            # [FR, E]
    if E_pad != E:
        x_T = jnp.pad(x_T, ((0, 0), (0, E_pad - E)))
        p_T = jnp.pad(p_T, ((0, 0), (0, E_pad - E)))

    out_T = pl.pallas_call(
        functools.partial(hermes_message_kernel, fr=FR, jm=JM),
        out_shape=jax.ShapeDtypeStruct((IN, E_pad), jnp.float32),
        grid_spec=pltpu.PrefetchScalarGridSpec(
            num_scalar_prefetch=0,
            grid=(n_tiles,),
            in_specs=[
                pl.BlockSpec((JM, tile_e), lambda i: (0, i)),
                pl.BlockSpec((FR, tile_e), lambda i: (0, i)),
                pl.BlockSpec((IN, FR * JM), lambda i: (0, 0)),   # constant, stays resident
                pl.BlockSpec((IN, 1), lambda i: (0, 0)),         # constant bias column
            ],
            out_specs=pl.BlockSpec((IN, tile_e), lambda i: (0, i)),
            scratch_shapes=[pltpu.VMEM((FR * JM, tile_e), jnp.float32)],
        ),
        compiler_params=pltpu.CompilerParams(
            dimension_semantics=("parallel",)),   # shards edge tiles across v7x TensorCores
    )(x_T, p_T, A2T, bias_col)

    # [IN, E_pad] -> drop padding -> [E, I, N] to match the PyTorch 'ein' layout.
    return out_T[:, :E].T.reshape(E, I, N)


def glorot_uniform(key, shape):
    # torch_geometric glorot: uniform(-s, s), s = sqrt(6 / (size(-2) + size(-1)))
    s = float(np.sqrt(6.0 / (shape[-2] + shape[-1])))
    return jax.random.uniform(key, shape, jnp.float32, minval=-s, maxval=s)


if __name__ == "__main__":
    # Small shapes consistent with the module:
    #   in_channels J=4, out_channels I=8, in_order=1 -> M=3 in-streams,
    #   out_order=1 -> N=3 out-streams, n_rings R=2, kernel basis B=6, F=5 freq terms.
    #   E=1000 edges: not a multiple of tile_e (exercises the padding path) and gives a
    #   2-step parallel grid at tile_e=512 (both v7x TensorCores active).
    E, J, I, M, N, B, F, R = 1000, 4, 8, 3, 3, 6, 5, 2

    key = jax.random.PRNGKey(0)
    k_inp, k_pre, k_ker, k_w, k_b = jax.random.split(key, 5)

    inp = jax.random.normal(k_inp, (E, J, M), jnp.float32)
    precomp = jax.random.normal(k_pre, (E, F, R), jnp.float32)

    # TODO(synk): build_kernel()/build_self_kernel() are external to the module; the harmonic
    # basis buffer is synthesized here deterministically with the same [B, F, N, M] shape.
    kernel_buf = jax.random.normal(k_ker, (B, F, N, M), jnp.float32)

    weight = glorot_uniform(k_w, (B, R, I, J))
    # reset_parameters() zero-inits bias; use small deterministic values so the bias path
    # is actually exercised (synthetic init, not a checkpoint).
    bias = 0.1 * jax.random.normal(k_b, (I,), jnp.float32)

    out = hermes_message_forward(inp, precomp, kernel_buf, weight, bias, tile_e=512)
    out = jax.block_until_ready(out)

    # Exact host-side float64 reference of the module math (f32 parameters/inputs).
    ref = np.einsum('ejm,efr,bfnm,brij->ein',
                    np.asarray(inp, np.float64), np.asarray(precomp, np.float64),
                    np.asarray(kernel_buf, np.float64), np.asarray(weight, np.float64))
    ref = ref + np.asarray(bias, np.float64)[None, :, None]

    # Tolerance is loosened because the E-scaled inputs are streamed in bf16 (perf choice);
    # outputs have RMS ~ sqrt(F*R*J*M) ~ 11, so atol=0.5 is ~4-5% of one std.
    err = float(np.max(np.abs(np.asarray(out, np.float64) - ref)))
    np.testing.assert_allclose(np.asarray(out, np.float64), ref, rtol=2e-2, atol=5e-1)
    print("KERNEL_OK")
</pallas_src>

<mosaic_0001>
module attributes {stable_mosaic.version = 11 : i64} {
  func.func @hermes_message_kernel(%arg0: i32, %arg1: memref<12x512xbf16, #tpu.memory_space<vmem>>, %arg2: memref<10x512xbf16, #tpu.memory_space<vmem>>, %arg3: memref<24x120xf32, #tpu.memory_space<vmem>>, %arg4: memref<24x1xf32, #tpu.memory_space<vmem>>, %arg5: memref<24x512xf32, #tpu.memory_space<vmem>>, %arg6: memref<120x512xf32, #tpu.memory_space<vmem>>) attributes {dimension_semantics = [#tpu.dimension_semantics<parallel>], iteration_bounds = array<i64: 2>, scalar_prefetch = 0 : i64, scratch_operands = 1 : i64, tpu.core_type = #tpu.core_type<tc>, window_params = [{transform_indices = @transform_0, window_bounds = array<i64: 12, 512>}, {transform_indices = @transform_1, window_bounds = array<i64: 10, 512>}, {pipeline_mode = #tpu.pipeline_mode<synchronous>, transform_indices = @transform_2, window_bounds = array<i64: 24, 120>}, {pipeline_mode = #tpu.pipeline_mode<synchronous>, transform_indices = @transform_3, window_bounds = array<i64: 24, 1>}, {transform_indices = @transform_4, window_bounds = array<i64: 24, 512>}]} {
    %c0 = arith.constant 0 : index
    %c0_0 = arith.constant 0 : index
    %0 = vector.load %arg1[%c0, %c0_0] : memref<12x512xbf16, #tpu.memory_space<vmem>>, vector<12x512xbf16>
    %1 = arith.extf %0 : vector<12x512xbf16> to vector<12x512xf32>
    %c0_1 = arith.constant 0 : index
    %c0_2 = arith.constant 0 : index
    %2 = vector.load %arg2[%c0_1, %c0_2] : memref<10x512xbf16, #tpu.memory_space<vmem>>, vector<10x512xbf16>
    %3 = arith.extf %2 : vector<10x512xbf16> to vector<10x512xf32>
    %4 = vector.extract_strided_slice %3 {offsets = [0, 0], sizes = [1, 512], strides = [1, 1]} : vector<10x512xf32> to vector<1x512xf32>
    %5 = vector.broadcast %4 : vector<1x512xf32> to vector<12x512xf32>
    %6 = arith.mulf %5, %1 : vector<12x512xf32>
    %c0_3 = arith.constant 0 : index
    %c0_4 = arith.constant 0 : index
    %7 = vector.load %arg6[%c0_3, %c0_4] : memref<120x512xf32, #tpu.memory_space<vmem>>, vector<12x512xf32>
    tpu.vector_store %arg6[%c0_3, %c0_4], %6 {strides = array<i32>} : memref<120x512xf32, #tpu.memory_space<vmem>>, vector<12x512xf32>,
    %8 = vector.extract_strided_slice %3 {offsets = [1, 0], sizes = [1, 512], strides = [1, 1]} : vector<10x512xf32> to vector<1x512xf32>
    %9 = vector.broadcast %8 : vector<1x512xf32> to vector<12x512xf32>
    %10 = arith.mulf %9, %1 : vector<12x512xf32>
    %c12 = arith.constant 12 : index
    %c0_5 = arith.constant 0 : index
    %11 = vector.load %arg6[%c12, %c0_5] : memref<120x512xf32, #tpu.memory_space<vmem>>, vector<12x512xf32>
    tpu.vector_store %arg6[%c12, %c0_5], %10 {strides = array<i32>} : memref<120x512xf32, #tpu.memory_space<vmem>>, vector<12x512xf32>,
    %12 = vector.extract_strided_slice %3 {offsets = [2, 0], sizes = [1, 512], strides = [1, 1]} : vector<10x512xf32> to vector<1x512xf32>
    %13 = vector.broadcast %12 : vector<1x512xf32> to vector<12x512xf32>
    %14 = arith.mulf %13, %1 : vector<12x512xf32>
    %c24 = arith.constant 24 : index
    %c0_6 = arith.constant 0 : index
    %15 = vector.load %arg6[%c24, %c0_6] : memref<120x512xf32, #tpu.memory_space<vmem>>, vector<12x512xf32>
    tpu.vector_store %arg6[%c24, %c0_6], %14 {strides = array<i32>} : memref<120x512xf32, #tpu.memory_space<vmem>>, vector<12x512xf32>,
    %16 = vector.extract_strided_slice %3 {offsets = [3, 0], sizes = [1, 512], strides = [1, 1]} : vector<10x512xf32> to vector<1x512xf32>
    %17 = vector.broadcast %16 : vector<1x512xf32> to vector<12x512xf32>
    %18 = arith.mulf %17, %1 : vector<12x512xf32>
    %c36 = arith.constant 36 : index
    %c0_7 = arith.constant 0 : index
    %19 = vector.load %arg6[%c36, %c0_7] : memref<120x512xf32, #tpu.memory_space<vmem>>, vector<12x512xf32>
    tpu.vector_store %arg6[%c36, %c0_7], %18 {strides = array<i32>} : memref<120x512xf32, #tpu.memory_space<vmem>>, vector<12x512xf32>,
    %20 = vector.extract_strided_slice %3 {offsets = [4, 0], sizes = [1, 512], strides = [1, 1]} : vector<10x512xf32> to vector<1x512xf32>
    %21 = vector.broadcast %20 : vector<1x512xf32> to vector<12x512xf32>
    %22 = arith.mulf %21, %1 : vector<12x512xf32>
    %c48 = arith.constant 48 : index
    %c0_8 = arith.constant 0 : index
    %23 = vector.load %arg6[%c48, %c0_8] : memref<120x512xf32, #tpu.memory_space<vmem>>, vector<12x512xf32>
    tpu.vector_store %arg6[%c48, %c0_8], %22 {strides = array<i32>} : memref<120x512xf32, #tpu.memory_space<vmem>>, vector<12x512xf32>,
    %24 = vector.extract_strided_slice %3 {offsets = [5, 0], sizes = [1, 512], strides = [1, 1]} : vector<10x512xf32> to vector<1x512xf32>
    %25 = vector.broadcast %24 : vector<1x512xf32> to vector<12x512xf32>
    %26 = arith.mulf %25, %1 : vector<12x512xf32>
    %c60 = arith.constant 60 : index
    %c0_9 = arith.constant 0 : index
    %27 = vector.load %arg6[%c60, %c0_9] : memref<120x512xf32, #tpu.memory_space<vmem>>, vector<12x512xf32>
    tpu.vector_store %arg6[%c60, %c0_9], %26 {strides = array<i32>} : memref<120x512xf32, #tpu.memory_space<vmem>>, vector<12x512xf32>,
    %28 = vector.extract_strided_slice %3 {offsets = [6, 0], sizes = [1, 512], strides = [1, 1]} : vector<10x512xf32> to vector<1x512xf32>
    %29 = vector.broadcast %28 : vector<1x512xf32> to vector<12x512xf32>
    %30 = arith.mulf %29, %1 : vector<12x512xf32>
    %c72 = arith.constant 72 : index
    %c0_10 = arith.constant 0 : index
    %31 = vector.load %arg6[%c72, %c0_10] : memref<120x512xf32, #tpu.memory_space<vmem>>, vector<12x512xf32>
    tpu.vector_store %arg6[%c72, %c0_10], %30 {strides = array<i32>} : memref<120x512xf32, #tpu.memory_space<vmem>>, vector<12x512xf32>,
    %32 = vector.extract_strided_slice %3 {offsets = [7, 0], sizes = [1, 512], strides = [1, 1]} : vector<10x512xf32> to vector<1x512xf32>
    %33 = vector.broadcast %32 : vector<1x512xf32> to vector<12x512xf32>
    %34 = arith.mulf %33, %1 : vector<12x512xf32>
    %c84 = arith.constant 84 : index
    %c0_11 = arith.constant 0 : index
    %35 = vector.load %arg6[%c84, %c0_11] : memref<120x512xf32, #tpu.memory_space<vmem>>, vector<12x512xf32>
    tpu.vector_store %arg6[%c84, %c0_11], %34 {strides = array<i32>} : memref<120x512xf32, #tpu.memory_space<vmem>>, vector<12x512xf32>,
    %36 = vector.extract_strided_slice %3 {offsets = [8, 0], sizes = [1, 512], strides = [1, 1]} : vector<10x512xf32> to vector<1x512xf32>
    %37 = vector.broadcast %36 : vector<1x512xf32> to vector<12x512xf32>
    %38 = arith.mulf %37, %1 : vector<12x512xf32>
    %c96 = arith.constant 96 : index
    %c0_12 = arith.constant 0 : index
    %39 = vector.load %arg6[%c96, %c0_12] : memref<120x512xf32, #tpu.memory_space<vmem>>, vector<12x512xf32>
    tpu.vector_store %arg6[%c96, %c0_12], %38 {strides = array<i32>} : memref<120x512xf32, #tpu.memory_space<vmem>>, vector<12x512xf32>,
    %40 = vector.extract_strided_slice %3 {offsets = [9, 0], sizes = [1, 512], strides = [1, 1]} : vector<10x512xf32> to vector<1x512xf32>
    %41 = vector.broadcast %40 : vector<1x512xf32> to vector<12x512xf32>
    %42 = arith.mulf %41, %1 : vector<12x512xf32>
    %c108 = arith.constant 108 : index
    %c0_13 = arith.constant 0 : index
    %43 = vector.load %arg6[%c108, %c0_13] : memref<120x512xf32, #tpu.memory_space<vmem>>, vector<12x512xf32>
    tpu.vector_store %arg6[%c108, %c0_13], %42 {strides = array<i32>} : memref<120x512xf32, #tpu.memory_space<vmem>>, vector<12x512xf32>,
    %c0_14 = arith.constant 0 : index
    %c0_15 = arith.constant 0 : index
    %44 = vector.load %arg3[%c0_14, %c0_15] : memref<24x120xf32, #tpu.memory_space<vmem>>, vector<24x120xf32>
    %c0_16 = arith.constant 0 : index
    %c0_17 = arith.constant 0 : index
    %45 = vector.load %arg6[%c0_16, %c0_17] : memref<120x512xf32, #tpu.memory_space<vmem>>, vector<120x512xf32>
    %cst = arith.constant dense<0.000000e+00> : vector<24x512xf32>
    %46 = tpu.matmul %44, %45, %cst {dimension_numbers = #tpu.dot_dimension_numbers<[1], [0], [0], [1], [0, 0, 1, 1], [], []>} : vector<24x120xf32>, vector<120x512xf32>, vector<24x512xf32> -> vector<24x512xf32>
    %c0_18 = arith.constant 0 : index
    %c0_19 = arith.constant 0 : index
    %47 = vector.load %arg4[%c0_18, %c0_19] : memref<24x1xf32, #tpu.memory_space<vmem>>, vector<24x1xf32>
    %48 = vector.broadcast %47 : vector<24x1xf32> to vector<24x512xf32>
    %49 = arith.addf %46, %48 : vector<24x512xf32>
    %c0_20 = arith.constant 0 : index
    %c0_21 = arith.constant 0 : index
    %50 = vector.load %arg5[%c0_20, %c0_21] : memref<24x512xf32, #tpu.memory_space<vmem>>, vector<24x512xf32>
    tpu.vector_store %arg5[%c0_20, %c0_21], %49 {strides = array<i32>} : memref<24x512xf32, #tpu.memory_space<vmem>>, vector<24x512xf32>,
    return
  }
  func.func @transform_0(%arg0: i32) -> (i32, i32) {
    %c0_i32 = arith.constant 0 : i32
    %c0_i32_0 = arith.constant 0 : i32
    return %c0_i32, %arg0 : i32, i32
  }
  func.func @transform_1(%arg0: i32) -> (i32, i32) {
    %c0_i32 = arith.constant 0 : i32
    %c0_i32_0 = arith.constant 0 : i32
    return %c0_i32, %arg0 : i32, i32
  }
  func.func @transform_2(%arg0: i32) -> (i32, i32) {
    %c0_i32 = arith.constant 0 : i32
    %c0_i32_0 = arith.constant 0 : i32
    %c0_i32_1 = arith.constant 0 : i32
    return %c0_i32, %c0_i32_0 : i32, i32
  }
  func.func @transform_3(%arg0: i32) -> (i32, i32) {
    %c0_i32 = arith.constant 0 : i32
    %c0_i32_0 = arith.constant 0 : i32
    %c0_i32_1 = arith.constant 0 : i32
    return %c0_i32, %c0_i32_0 : i32, i32
  }
  func.func @transform_4(%arg0: i32) -> (i32, i32) {
    %c0_i32 = arith.constant 0 : i32
    %c0_i32_0 = arith.constant 0 : i32
    return %c0_i32, %arg0 : i32, i32
  }
}

</mosaic_0001>

<bundles_post_ra>
// kernel: tpu_custom_call.1
= control target key start
LH: loop header
LB: loop body
LE: loop exit
PB: predicated region body
PF: predicated region fallthrough
CT: control target
= control target key end

     0   :  { %s1603_s0 = inlined_call_operand.hbm [shape: bf16[12,1024], index: 0, kind: input, shape index: {}]   ;;  %s1604_s1 = inlined_call_operand.hbm [shape: bf16[10,1024], index: 1, kind: input, shape index: {}]   ;;  %s1605_s2 = inlined_call_operand.vmem [shape: f32[24,120], index: 2, kind: input, shape index: {}]   ;;  %s1606_s3 = inlined_call_operand.vmem [shape: f32[24,1], index: 3, kind: input, shape index: {}]   ;;  %s1607_s4 = inlined_call_operand.hbm [shape: f32[24,1024], index: 4, kind: output, shape index: {}]  }
   0x1   :  { %1610 = sst [smem:[#allocation14_spill]] %s1603_s0 }
   0x2   :  { %9 = vsyncpa [#allocation4], 0 }
   0x3   :  { %11 = vsyncpa [#allocation4 + $0x1], 0 }
   0x4   :  { %12 = vsyncpa [#allocation7], 0 }
   0x5   :  { %14 = vsyncpa [#allocation7 + $0x1], 0 }
   0x6   :  { %15 = vsyncpa [#allocation5], 0 }
   0x7   :  { %17 = vsyncpa [#allocation5 + $0x1], 0  ;;  %s1203_s15 = smov 0   ;;  %s1205_s16 = smov 0  }
   0x8   :  { %s1207_s17 = smov 0   ;;  %s1209_s18 = smov 0  }
   0x9 LB: > { %1611 = sst [smem:[#allocation12_spill]] %s1165_s17  ;;  %s1224_s19 = sadd.s32 4294967295, %s1169_s18   ;;  %s1169_s18 = sphi %s1209_s18, %s1625_s18   ;;  %s1165_s17 = sphi %s1207_s17, %s1622_s17   ;;  %s1161_s16 = sphi %s1205_s16, %s1624_s16   ;;  %s1157_s15 = sphi %s1203_s15, %s1623_s15  }
   0xa   : > { %s947_s20 = sadd.s32 4294967294, %s1169_s18   ;;  %s1228_s21 = sadd.s32 1, %s1169_s18  }
   0xb   : > { %s30_s22 = sadd.s32 1, %s1165_s17  ;;  %s27_s23 = ssub.s32 %s1169_s18, %s1228_s21 }
   0xc   : > { %p37_p0 = scmp.ne.s32.totalorder %s1165_s17, %s1161_s16  ;;  %p28_p1 = scmp.eq.s32.totalorder %s27_s23, 0 }
   0xd   : > { %p38_p2 = scmp.eq.s32.totalorder %s1169_s18, 0  ;;  %p43_p3 = scmp.ne.s32.totalorder %s1161_s16, %s1157_s15 }
   0xe   : > { %p44_p4 = scmp.eq.s32.totalorder %s1224_s19, 0  ;;  %p135_p7 = scmp.eq.s32.totalorder %s1224_s19, 1 }
   0xf   : > { %s1240_s24 = scalar_select %p28_p1, %s1165_s17, %s30_s22  }
  0x10   : > { %p1242_p5 = por %p38_p2, %p37_p0  ;;  %p1246_p6 = por %p44_p4, %p43_p3 }
  0x11   : > { %1612 = sst [smem:[#allocation13_spill]] %s1240_s24  ;;  %p141_p8 = scmp.eq.s32.totalorder %s947_s20, 1 }
  0x12   : > { %p949_p9 = scmp.ge.s32.totalorder %s1169_s18, 2  ;;  %p996_p10 = scmp.lt.s32.totalorder %s1169_s18, 2 }
  0x13   : > { %p1253_p11 = por %p135_p7, %p37_p0  ;;  %p1257_p12 = por %p141_p8, %p43_p3 }
  0x14   : > { %s1262_s29 = sand.u32 1, %s1165_s17   ;;  %s975_s30 = sshll.u32 %s1169_s18, 4 }
  0x15   : > { %s1608_s5 = sshll.u32 %s1262_s29, 5  ;;  %s1617_s0 = sld [smem:[#allocation14_spill]] }
  0x16   : > { %s171_s10 = scalar_lea.vmem [#allocation3], %s1608_s5  ;;  %p1275_p13 = pnand %p996_p10, %p1242_p5 }
  0x17   : > { %s179_s11 = sshll.u32 %s171_s10, 4  ;;  %p956_p0 = scmp.ge.s32.totalorder %s1169_s18, 1  ;;  %s180_s11 = int_to_ptr.vmem [resolvable:$true] %s179_s11 }
  0x18   : > { %s168_s13 = scalar_lea.sflag [#allocation4], %s1262_s29  ;;  %p1043_p2 = pneg %p1275_p13 }
  0x1b   : > { %s176_s8 = scalar_lea.hbm %s1617_s0, %s975_s30  ;;  %s1046_s25 = scalar_lea.hbm %s1617_s0, 64 }
  0x1c   : > { %s177_s9 = sshll.u32 %s176_s8, 4  ;;  %s178_s9 = int_to_ptr.hbm [resolvable:$true] %s177_s9 }
  0x1d   : > { %s1039_s14 = sshra.s32 %s178_s9, 4  ;;  %s1040_s14 = int_to_ptr.hbm [resolvable:$true] %s1039_s14 }
  0x1e   : > { %s1041_s20 = scalar_lea.hbm %s1040_s14, 32  ;;  %p1047_p5 = scmp.lt.s32.totalorder %s1040_s14, %s1617_s0 }
  0x1f   : > { %p1042_p1 = scmp.ne.s32.totalorder %s1040_s14, %s1041_s20  ;;  %p1048_p7 = scmp.lt.s32.totalorder %s1046_s25, %s1041_s20 }
  0x21   : > { %p1044_p3 = pnand %p1043_p2, %p1042_p1  ;;  %p1049_p8 = por %p1048_p7, %p1047_p5 }
  0x23   : > { %p1045_p4 = pneg %p1044_p3 }
  0x25   : > { %p1050_p10 = pnand %p1049_p8, %p1045_p4 }
  0x27   : > { %1053 = shalt.err (!%p1050_p10)
}
  0x28   : > { %s1171_s8 = smov 512   ;;  %s1172_s10 = smov 256  }
  0x29   : > { %s1173_s5 = smov 16   ;;  %p209_p1 = scmp.lt.s32.totalorder %s1169_s18, 3 }
  0x2a   : > { %988 = dma.hbm_to_vmem [thread:$0]  (!%p1275_p13), %s178_s9, 512, %s180_s11, %s168_s13, %s1171_s8, %s1172_s10, %s1173_s5  }
  0x2b   : > { %s198_s22 = scalar_lea.hbm %s1604_s1, %s975_s30  ;;  %p1303_p3 = pnand %p956_p0, %p209_p1 }
  0x2c   : > { %s199_s25 = sshll.u32 %s198_s22, 4  ;;  %s1620_s6 = sshll.u32 %s1262_s29, 5  ;;  %s200_s25 = int_to_ptr.hbm [resolvable:$true] %s199_s25 }
  0x2d   : > { %s193_s7 = scalar_lea.vmem [#allocation6], %s1620_s6  ;;  %s190_s24 = scalar_lea.sflag [#allocation7], %s1262_s29 }
  0x2e   : > { %s201_s0 = sshll.u32 %s193_s7, 4  ;;  %s1069_s17 = sshra.s32 %s200_s25, 4  ;;  %s202_s0 = int_to_ptr.vmem [resolvable:$true] %s201_s0  ;;  %s1070_s17 = int_to_ptr.hbm [resolvable:$true] %s1069_s17 }
  0x2f   : > { %s1071_s9 = scalar_lea.hbm %s1070_s17, 32  ;;  %s1076_s13 = scalar_lea.hbm %s1604_s1, 64 }
  0x30   : > { %p1072_p4 = scmp.ne.s32.totalorder %s1070_s17, %s1071_s9  ;;  %p1077_p0 = scmp.lt.s32.totalorder %s1070_s17, %s1604_s1 }
  0x31   : > { %p1078_p8 = scmp.lt.s32.totalorder %s1076_s13, %s1071_s9 }
  0x32   : > { %p1074_p5 = pnand %p1072_p4, %p1043_p2 }
  0x33   : > { %p1079_p10 = por %p1078_p8, %p1077_p0 }
  0x34   : > { %p1075_p7 = pneg %p1074_p5 }
  0x36   : > { %p1080_p1 = pnand %p1079_p10, %p1075_p7 }
  0x38   : > { %1083 = shalt.err (!%p1080_p1)
}
  0x39   : > { %991 = dma.hbm_to_vmem [thread:$0]  (!%p1275_p13), %s200_s25, 512, %s202_s0, %s190_s24, %s1171_s8, %s1172_s10, %s1173_s5  }
  0x3a   : > { %213 = sbr.rel (%p1303_p3) target bundleno = 285 (0x11d), region = 36  ;;  %s1325_s29 = sand.u32 (!%p1303_p3), 1, %s1161_s16  }
  0x3b   : > { %s957_s22 = sshll.u32 (!%p1303_p3), %s1325_s29, 5  ;;  %s216_s6 = scalar_lea.sflag (!%p1303_p3), [#allocation4], %s1325_s29 }
  0x3c   : > { %s219_s17 = scalar_lea.vmem (!%p1303_p3), [#allocation3], %s957_s22 }
  0x3f   : > { %1144 = dma.done.wait (%p1246_p6), %s216_s6, 512  }
  0x40   : > { %1146 = vsyncadd (%p1246_p6), %s216_s6, 4294966784  ;;  %s226_s0 = scalar_lea.sflag [#allocation7], %s1325_s29  ;;  %s1334_s24 = scalar_lea.vmem [#allocation6], %s957_s22 }
  0x41   : > { %1148 = dma.done.wait (%p1246_p6), %s226_s0, 512  }
  0x42   : > { %1150 = vsyncadd (%p1246_p6), %s226_s0, 4294966784  ;;  %v264_v0 = vld [vmem:[%s219_s17 + $0x8] sm:$0xff]  ;;  %v266_v1 = vld [vmem:[%s219_s17 + $0x18] sm:$0x33]  ;;  %vm327_vm0 = vcmask 1043456   ;;  %vm709_vm1 = vcmask 982016  }
  0x43   : > { %v278_v2 = vld [vmem:[%s1334_s24 + $0x18] sm:$0x11]  ;;  %v1341_v3 = vunpack.c.l.bf16 %v264_v0  ;;  %v1343_v4 = vunpack.c.l.bf16 %v266_v1  ;;  %v263_v6 = vld [vmem:[%s219_s17] sm:$0xff]  ;;  %v265_v7 = vld [vmem:[%s219_s17 + $0x10] sm:$0x33]  ;;  %v1348_v9 = vunpack.c.h.bf16 %v264_v0  ;;  %v1350_v10 = vunpack.c.h.bf16 %v266_v1  ;;  %s978_s14 = smul.u32 96, %s1325_s29 }
  0x44   : > { %v285_v5 = vunpack.c.l.bf16 %v278_v2  ;;  %v1346_v8 = vld [vmem:[%s1334_s24 + $0x10] sm:$0x11]  ;;  %v286_v11 = vunpack.c.h.bf16 %v278_v2  ;;  %v1352_v14 = vunpack.c.l.bf16 %v263_v6  ;;  %v1355_v18 = vunpack.c.l.bf16 %v265_v7  ;;  %v276_v24 = vld [vmem:[%s1334_s24 + $0x8] sm:$0xff]  ;;  %v275_v55 = vld [vmem:[%s1334_s24] sm:$0xff]  ;;  %s977_s22 = sshll.u32 %s1224_s19, 5  ;;  %s836_s26 = scalar_lea.sflag [#allocation5], %s1325_s29 }
  0x45   : > { %v283_v15 = vunpack.c.l.bf16 %v1346_v8  ;;  %v284_v19 = vunpack.c.h.bf16 %v1346_v8  ;;  %v1361_v23 = vunpack.c.h.bf16 %v263_v6  ;;  %v1367_v28 = vunpack.c.h.bf16 %v265_v7  ;;  %s1555_s20 = scalar_lea.vmem [#allocation8], %s978_s14  ;;  %s847_s0 = scalar_lea.hbm %s1607_s4, %s977_s22 }
  0x46   : > { %v582_v12 = vperm.slane %v285_v5, 1  ;;  %v562_v13 = vperm.slane %v285_v5, 0  ;;  %v583_v16 = vperm.slane %v286_v11, 1  ;;  %v563_v17 = vperm.slane %v286_v11, 0  ;;  %s848_s24 = sshll.u32 %s1555_s20, 4  ;;  %s850_s19 = sshll.u32 %s847_s0, 4  ;;  %s849_s24 = int_to_ptr.vmem [resolvable:$true] %s848_s24  ;;  %s851_s19 = int_to_ptr.hbm [resolvable:$true] %s850_s19 }
  0x47   : > { %v580_v31 = vperm.slane %v283_v15, 1  ;;  %v581_v32 = vperm.slane %v284_v19, 1  ;;  %v1369_v35 = vunpack.c.l.bf16 %v276_v24  ;;  %v1371_v36 = vunpack.c.h.bf16 %v276_v24  ;;  %s1113_s5 = sshra.s32 %s851_s19, 4  ;;  %s1119_s23 = scalar_lea.hbm %s1607_s4, 192  ;;  %s1114_s5 = int_to_ptr.hbm [resolvable:$true] %s1113_s5 }
  0x48   : > { %v586_v20 = vmul.f32 %v582_v12, %v1341_v3  ;;  %v590_v21 = vmul.f32 %v582_v12, %v1343_v4  ;;  %v570_v22 = vmul.f32 %v562_v13, %v1343_v4  ;;  %v587_v25 = vmul.f32 %v583_v16, %v1348_v9  ;;  %s1115_s12 = scalar_lea.hbm %s1114_s5, 96  ;;  %p1120_p3 = scmp.lt.s32.totalorder %s1114_s5, %s1607_s4 }
  0x49   : > { %v591_v26 = vmul.f32 %v583_v16, %v1350_v10  ;;  %v571_v27 = vmul.f32 %v563_v17, %v1350_v10  ;;  %v584_v38 = vmul.f32 %v580_v31, %v1352_v14  ;;  %v588_v39 = vmul.f32 %v580_v31, %v1355_v18  ;;  %p1116_p6 = scmp.ne.s32.totalorder %s1114_s5, %s1115_s12  ;;  %p1121_p4 = scmp.lt.s32.totalorder %s1119_s23, %s1115_s12 }
  0x4a   : > { %v602_v29 = vrot.slane %v586_v20, 4  ;;  %v608_v30 = vrot.slane %v590_v21, 4  ;;  %578 = vst [vmem:[#allocation2 + $0x1c8] sm:$0xf] %v570_v22  ;;  %v603_v33 = vrot.slane %v587_v25, 4  ;;  %v585_v40 = vmul.f32 %v581_v32, %v1361_v23 }
  0x4b   : > { %v610_v34 = vrot.slane %v591_v26, 4  ;;  %579 = vst [vmem:[#allocation2 + $0x90] sm:$0xf] %v571_v27  ;;  %v589_v42 = vmul.f32 %v581_v32, %v1367_v28  ;;  %v514_v43 = vperm.slane %v1369_v35, 7  ;;  %v515_v44 = vperm.slane %v1371_v36, 7  ;;  %p1117_p13 = pnand %p1116_p6, %p1253_p11  ;;  %p1122_p5 = por %p1121_p4, %p1120_p3 }
  0x4c   : > { %v609_v37 = vsel %vm327_vm0, %v602_v29, %v608_v30  ;;  %622 = vst [vmem:[#allocation2 + $0x1c8] sm:$0xf0] %v602_v29  ;;  %v566_v45 = vmul.f32 %v562_v13, %v1341_v3  ;;  %v567_v46 = vmul.f32 %v563_v17, %v1348_v9  ;;  %v600_v47 = vrot.slane %v584_v38, 4 }
  0x4d   : > { %772 = vmatpush.msra.mxu2 %v609_v37  ;;  %v611_v41 = vsel %vm327_vm0, %v603_v33, %v610_v34  ;;  %v604_v48 = vrot.slane %v588_v39, 4  ;;  %623 = vst [vmem:[#allocation2 + $0x90] sm:$0xf0] %v603_v33  ;;  %v601_v49 = vrot.slane %v585_v40, 4  ;;  %v606_v50 = vrot.slane %v589_v42, 4  ;;  %p1118_p2 = pneg %p1117_p13 }
  0x4e   : > { %798 = vmatpush.msra.mxu3 %v611_v41  ;;  %v518_v51 = vmul.f32 %v514_v43, %v1341_v3  ;;  %v522_v52 = vmul.f32 %v514_v43, %v1343_v4  ;;  %v523_v54 = vmul.f32 %v515_v44, %v1350_v10  ;;  %v519_v58 = vmul.f32 %v515_v44, %v1348_v9 }
  0x4f   : > { %v605_v53 = vsel %vm327_vm0, %v600_v47, %v604_v48  ;;  %v607_v56 = vsel %vm327_vm0, %v601_v49, %v606_v50  ;;  %v560_v59 = vperm.slane %v283_v15, 0  ;;  %620 = vst [vmem:[#allocation2 + $0x178] sm:$0xf0] %v600_v47  ;;  %v561_v63 = vperm.slane %v284_v19, 0  ;;  %p1123_p7 = pnand %p1122_p5, %p1118_p2 }
  0x50   : > { %720 = vmatpush.msra.mxu0 %v605_v53  ;;  %v540_v57 = vrot.slane %v522_v52, 4  ;;  %746 = vmatpush.msra.mxu1 %v607_v56  ;;  %v534_v61 = vrot.slane %v518_v51, 4  ;;  %v542_v62 = vrot.slane %v523_v54, 4  ;;  %v1390_v0 = vunpack.c.l.bf16 %v275_v55  ;;  %621 = vst [vmem:[#allocation2 + $0x70] sm:$0xf0] %v601_v49 }
  0x51   : > { %v494_v1 = vperm.slane %v1369_v35, 6  ;;  %v535_v5 = vrot.slane %v519_v58, 4  ;;  %v495_v6 = vperm.slane %v1371_v36, 6  ;;  %v1395_v7 = vunpack.c.h.bf16 %v275_v55 }
  0x52   : > { %v541_v2 = vsel %vm327_vm0, %v534_v61, %v540_v57  ;;  %v568_v11 = vmul.f32 %v560_v59, %v1355_v18  ;;  %554 = vst [vmem:[#allocation2 + $0x38] sm:$0xf0] %v534_v61  ;;  %v569_v13 = vmul.f32 %v561_v63, %v1367_v28  ;;  %v512_v15 = vperm.slane %v1390_v0, 7 }
  0x53   : > { %v685_v60 = vld [vmem:[#allocation2 + $0x1c8] sm:$0xff]  ;;  %v543_v12 = vsel %vm327_vm0, %v535_v5, %v542_v62  ;;  %v502_v16 = vmul.f32 %v494_v1, %v1343_v4  ;;  %555 = vst [vmem:[#allocation2 + $0x20] sm:$0xf0] %v535_v5  ;;  %v503_v17 = vmul.f32 %v495_v6, %v1350_v10  ;;  %v513_v20 = vperm.slane %v1395_v7, 7 }
  0x54   : > { %773 = vmatpush.msra.mxu2 %v685_v60  ;;  %v686_v8 = vld [vmem:[#allocation2 + $0x90] sm:$0xff]  ;;  %v520_v19 = vmul.f32 %v512_v15, %v1355_v18  ;;  %576 = vst [vmem:[#allocation2 + $0x178] sm:$0xf] %v568_v11  ;;  %v516_v21 = vmul.f32 %v512_v15, %v1352_v14  ;;  %v446_v24 = vperm.slane %v1369_v35, 5  ;;  %v564_v25 = vmul.f32 %v560_v59, %v1352_v14 }
  0x55   : > { %799 = vmatpush.msra.mxu3 %v686_v8  ;;  %577 = vst [vmem:[#allocation2 + $0x70] sm:$0xf] %v569_v13  ;;  %v521_v22 = vmul.f32 %v513_v20, %v1367_v28  ;;  %v447_v26 = vperm.slane %v1371_v36, 5  ;;  %v565_v27 = vmul.f32 %v561_v63, %v1361_v23  ;;  %v517_v30 = vmul.f32 %v513_v20, %v1361_v23 }
  0x56   : > { %774 = vmatpush.msra.mxu2 %v566_v45  ;;  %510 = vst [vmem:[#allocation2 + $0x38] sm:$0xf] %v502_v16  ;;  %v536_v29 = vrot.slane %v520_v19, 4  ;;  %v454_v31 = vmul.f32 %v446_v24, %v1343_v4  ;;  %v498_v32 = vmul.f32 %v494_v1, %v1341_v3  ;;  %v499_v34 = vmul.f32 %v495_v6, %v1348_v9 }
  0x57   : > { %800 = vmatpush.msra.mxu3 %v567_v46  ;;  %511 = vst [vmem:[#allocation2 + $0x20] sm:$0xf] %v503_v17  ;;  %v455_v33 = vmul.f32 %v447_v26, %v1350_v10  ;;  %v532_v37 = vrot.slane %v516_v21, 4  ;;  %v538_v38 = vrot.slane %v521_v22, 4  ;;  %v450_v39 = vmul.f32 %v446_v24, %v1341_v3 }
  0x58   : > { %775 = vmatpush.msra.mxu2 %v541_v2  ;;  %v451_v40 = vmul.f32 %v447_v26, %v1348_v9  ;;  %v533_v43 = vrot.slane %v517_v30, 4  ;;  %v472_v44 = vrot.slane %v454_v31, 4  ;;  %v492_v47 = vperm.slane %v1390_v0, 6 }
  0x59   : > { %801 = vmatpush.msra.mxu3 %v543_v12  ;;  %v537_v42 = vsel %vm327_vm0, %v532_v37, %v536_v29  ;;  %v474_v46 = vrot.slane %v455_v33, 4  ;;  %552 = vst [vmem:[#allocation2 + $0xb8] sm:$0xf0] %v532_v37  ;;  %v466_v50 = vrot.slane %v450_v39, 4  ;;  %v493_v51 = vperm.slane %v1395_v7, 6 }
  0x5a   : > { %v539_v49 = vsel %vm327_vm0, %v533_v43, %v538_v38  ;;  %v467_v53 = vrot.slane %v451_v40, 4  ;;  %v426_v54 = vperm.slane %v1369_v35, 4  ;;  %553 = vst [vmem:[#allocation2] sm:$0xf0] %v533_v43  ;;  %v427_v56 = vperm.slane %v1371_v36, 4 }
  0x5b   : > { %v683_v41 = vld [vmem:[#allocation2 + $0x178] sm:$0xff]  ;;  %v473_v55 = vsel %vm327_vm0, %v466_v50, %v472_v44  ;;  %v500_v58 = vmul.f32 %v492_v47, %v1355_v18  ;;  %486 = vst [vmem:[#allocation2 + $0xc0] sm:$0xf0] %v466_v50  ;;  %v501_v59 = vmul.f32 %v493_v51, %v1367_v28  ;;  %v444_v60 = vperm.slane %v1390_v0, 5 }
  0x5c   : > { %721 = vmatpush.msra.mxu0 %v683_v41  ;;  %v684_v45 = vld [vmem:[#allocation2 + $0x70] sm:$0xff]  ;;  %v475_v57 = vsel %vm327_vm0, %v467_v53, %v474_v46  ;;  %v434_v61 = vmul.f32 %v426_v54, %v1343_v4  ;;  %487 = vst [vmem:[#allocation2 + $0xa0] sm:$0xf0] %v467_v53  ;;  %v435_v62 = vmul.f32 %v427_v56, %v1350_v10  ;;  %v445_v1 = vperm.slane %v1395_v7, 5 }
  0x5d   : > { %747 = vmatpush.msra.mxu1 %v684_v45  ;;  %v673_v48 = vld [vmem:[#allocation2 + $0x38] sm:$0xff]  ;;  %v452_v63 = vmul.f32 %v444_v60, %v1355_v18  ;;  %508 = vst [vmem:[#allocation2 + $0xb8] sm:$0xf] %v500_v58  ;;  %v378_v2 = vperm.slane %v1369_v35, 3  ;;  %v379_v5 = vperm.slane %v1371_v36, 3  ;;  %v448_v6 = vmul.f32 %v444_v60, %v1352_v14 }
  0x5e   : > { %776 = vmatpush.msra.mxu2 %v673_v48  ;;  %v674_v52 = vld [vmem:[#allocation2 + $0x20] sm:$0xff]  ;;  %722 = vmatpush.msra.mxu0 %v564_v25  ;;  %509 = vst [vmem:[#allocation2] sm:$0xf] %v501_v59  ;;  %v453_v8 = vmul.f32 %v445_v1, %v1367_v28  ;;  %v496_v11 = vmul.f32 %v492_v47, %v1352_v14  ;;  %v424_v24 = vperm.slane %v1390_v0, 4  ;;  %v308_v29 = vperm.slane %v1395_v7, 1 }
  0x5f   : > { %802 = vmatpush.msra.mxu3 %v674_v52  ;;  %748 = vmatpush.msra.mxu1 %v565_v27  ;;  %442 = vst [vmem:[#allocation2 + $0xc0] sm:$0xf] %v434_v61  ;;  %v497_v12 = vmul.f32 %v493_v51, %v1361_v23  ;;  %v430_v13 = vmul.f32 %v426_v54, %v1341_v3  ;;  %v468_v15 = vrot.slane %v452_v63, 4  ;;  %v464_v25 = vrot.slane %v448_v6, 4 }
  0x60   : > { %777 = vmatpush.msra.mxu2 %v498_v32  ;;  %723 = vmatpush.msra.mxu0 %v537_v42  ;;  %443 = vst [vmem:[#allocation2 + $0xa0] sm:$0xf] %v435_v62  ;;  %v449_v16 = vmul.f32 %v445_v1, %v1361_v23  ;;  %v386_v17 = vmul.f32 %v378_v2, %v1343_v4  ;;  %v470_v26 = vrot.slane %v453_v8, 4  ;;  %v307_v27 = vperm.slane %v1390_v0, 1 }
  0x61   : > { %803 = vmatpush.msra.mxu3 %v499_v34  ;;  %749 = vmatpush.msra.mxu1 %v539_v49  ;;  %v387_v19 = vmul.f32 %v379_v5, %v1350_v10  ;;  %v431_v20 = vmul.f32 %v427_v56, %v1348_v9  ;;  %v382_v21 = vmul.f32 %v378_v2, %v1341_v3  ;;  %v425_v38 = vperm.slane %v1395_v7, 4 }
  0x62   : > { %778 = vmatpush.msra.mxu2 %v473_v55  ;;  %v383_v22 = vmul.f32 %v379_v5, %v1348_v9  ;;  %v469_v31 = vsel %vm327_vm0, %v464_v25, %v468_v15  ;;  %v465_v32 = vrot.slane %v449_v16, 4  ;;  %v404_v33 = vrot.slane %v386_v17, 4  ;;  %484 = vst [vmem:[#allocation2 + $0x8] sm:$0xf0] %v464_v25 }
  0x63   : > { %804 = vmatpush.msra.mxu3 %v475_v57  ;;  %v406_v34 = vrot.slane %v387_v19, 4  ;;  %v1452_v39 = vmul.f32 %v307_v27, %v1352_v14  ;;  %v1455_v40 = vmul.f32 %v308_v29, %v1361_v23  ;;  %v398_v43 = vrot.slane %v382_v21, 4 }
  0x64   : > { %v671_v30 = vld [vmem:[#allocation2 + $0xb8] sm:$0xff]  ;;  %v471_v42 = vsel %vm327_vm0, %v465_v32, %v470_v26  ;;  %v399_v44 = vrot.slane %v383_v22, 4  ;;  %v432_v45 = vmul.f32 %v424_v24, %v1355_v18  ;;  %v358_v47 = vperm.slane %v1369_v35, 2  ;;  %485 = vst [vmem:[#allocation2 + $0x170] sm:$0xf0] %v465_v32 }
  0x65   : > { %724 = vmatpush.msra.mxu0 %v671_v30  ;;  %v672_v37 = vld [vmem:[#allocation2] sm:$0xff]  ;;  %v315_v48 = vmul.f32 %v307_v27, %v1355_v18  ;;  %v316_v49 = vmul.f32 %v308_v29, %v1367_v28  ;;  %v405_v50 = vsel %vm327_vm0, %v398_v43, %v404_v33  ;;  %v359_v52 = vperm.slane %v1371_v36, 2  ;;  %418 = vst [vmem:[#allocation2 + $0x138] sm:$0xf0] %v398_v43 }
  0x66   : > { %750 = vmatpush.msra.mxu1 %v672_v37  ;;  %v661_v41 = vld [vmem:[#allocation2 + $0xc0] sm:$0xff]  ;;  %v407_v51 = vsel %vm327_vm0, %v399_v44, %v406_v34  ;;  %v328_v53 = vrot.slane %v1452_v39, 4  ;;  %v329_v55 = vrot.slane %v1455_v40, 4  ;;  %v433_v57 = vmul.f32 %v425_v38, %v1367_v28  ;;  %419 = vst [vmem:[#allocation2 + $0x140] sm:$0xf0] %v399_v44  ;;  %v629_v39 = vld [vmem:[%s1605_s2 + $0x8] sm:$0xff] }
  0x67   : > { %779 = vmatpush.msra.mxu2 %v661_v41  ;;  %v662_v46 = vld [vmem:[#allocation2 + $0xa0] sm:$0xff]  ;;  %725 = vmatpush.msra.mxu0 %v496_v11  ;;  %v332_v54 = vrot.slane %v315_v48, 4  ;;  %v334_v56 = vrot.slane %v316_v49, 4  ;;  %v376_v58 = vperm.slane %v1390_v0, 3  ;;  %v366_v59 = vmul.f32 %v358_v47, %v1343_v4  ;;  %440 = vst [vmem:[#allocation2 + $0x8] sm:$0xf] %v432_v45 }
  0x68   : > { %805 = vmatpush.msra.mxu3 %v662_v46  ;;  %751 = vmatpush.msra.mxu1 %v497_v12  ;;  %v367_v62 = vmul.f32 %v359_v52, %v1350_v10  ;;  %v377_v1 = vperm.slane %v1395_v7, 3  ;;  %441 = vst [vmem:[#allocation2 + $0x170] sm:$0xf] %v433_v57  ;;  %v309_v6 = vperm.slane %v1369_v35, 1  ;;  %v428_v8 = vmul.f32 %v424_v24, %v1352_v14 }
  0x69   : > { %780 = vmatpush.msra.mxu2 %v430_v13  ;;  %726 = vmatpush.msra.mxu0 %v469_v31  ;;  %v1473_v60 = vsel %vm327_vm0, %v328_v53, %v332_v54  ;;  %v1478_v61 = vsel %vm327_vm0, %v329_v55, %v334_v56  ;;  %v384_v63 = vmul.f32 %v376_v58, %v1355_v18  ;;  %v310_v11 = vperm.slane %v1371_v36, 1 }
  0x6a   : > { %806 = vmatpush.msra.mxu3 %v431_v20  ;;  %752 = vmatpush.msra.mxu1 %v471_v42  ;;  %v380_v2 = vmul.f32 %v376_v58, %v1352_v14  ;;  %v385_v5 = vmul.f32 %v377_v1, %v1367_v28  ;;  %374 = vst [vmem:[#allocation2 + $0x138] sm:$0xf] %v366_v59  ;;  %v356_v33 = vperm.slane %v1390_v0, 2  ;;  %v357_v41 = vperm.slane %v1395_v7, 2 }
  0x6b   : > { %781 = vmatpush.msra.mxu2 %v405_v50  ;;  %375 = vst [vmem:[#allocation2 + $0x140] sm:$0xf] %v367_v62  ;;  %v429_v12 = vmul.f32 %v425_v38, %v1361_v23  ;;  %v400_v13 = vrot.slane %v384_v63, 4  ;;  %v381_v15 = vmul.f32 %v377_v1, %v1361_v23  ;;  %v317_v16 = vmul.f32 %v309_v6, %v1343_v4  ;;  %v693_v63 = vld [vmem:[%s1606_s3 + $0x10] sm:$0xff] }
  0x6c   : > { %807 = vmatpush.msra.mxu3 %v407_v51  ;;  %v362_v17 = vmul.f32 %v358_v47, %v1341_v3  ;;  %v318_v19 = vmul.f32 %v310_v11, %v1350_v10  ;;  %v363_v20 = vmul.f32 %v359_v52, %v1348_v9  ;;  %v396_v21 = vrot.slane %v380_v2, 4  ;;  %348 = vst [vmem:[#allocation2 + $0x50] sm:$0xf0] %v328_v53 }
  0x6d   : > { %v402_v22 = vrot.slane %v385_v5, 4  ;;  %v313_v24 = vmul.f32 %v309_v6, %v1341_v3  ;;  %v314_v25 = vmul.f32 %v310_v11, %v1348_v9  ;;  %v397_v29 = vrot.slane %v381_v15, 4  ;;  %349 = vst [vmem:[#allocation2 + $0x168] sm:$0xf0] %v329_v55 }
  0x6e   : > { %v659_v26 = vld [vmem:[#allocation2 + $0x8] sm:$0xff]  ;;  %v401_v27 = vsel %vm327_vm0, %v396_v21, %v400_v13  ;;  %v336_v30 = vrot.slane %v317_v16, 4  ;;  %v338_v32 = vrot.slane %v318_v19, 4  ;;  %416 = vst [vmem:[#allocation2 + $0xe0] sm:$0xf0] %v396_v21  ;;  %v289_v44 = vperm.slane %v1369_v35, 0 }
  0x6f   : > { %727 = vmatpush.msra.mxu0 %v659_v26  ;;  %v660_v31 = vld [vmem:[#allocation2 + $0x170] sm:$0xff]  ;;  %v403_v37 = vsel %vm327_vm0, %v397_v29, %v402_v22  ;;  %v330_v38 = vrot.slane %v313_v24, 4  ;;  %v331_v43 = vrot.slane %v314_v25, 4  ;;  %417 = vst [vmem:[#allocation2 + $0x188] sm:$0xf0] %v397_v29  ;;  %v290_v46 = vperm.slane %v1371_v36, 0 }
  0x70   : > { %753 = vmatpush.msra.mxu1 %v660_v31  ;;  %v364_v48 = vmul.f32 %v356_v33, %v1355_v18  ;;  %v365_v49 = vmul.f32 %v357_v41, %v1367_v28  ;;  %v297_v35 = vmul.f32 %v289_v44, %v1343_v4  ;;  %v691_v36 = vld [vmem:[%s1606_s3] sm:$0xff]  ;;  %v1174_v51 = vmov 0  }
  0x71   : > { %v649_v34 = vld [vmem:[#allocation2 + $0x138] sm:$0xff]  ;;  %728 = vmatpush.msra.mxu0 %v428_v8  ;;  %v337_v45 = vsel %vm327_vm0, %v330_v38, %v336_v30  ;;  %v339_v47 = vsel %vm327_vm0, %v331_v43, %v338_v32  ;;  %350 = vst [vmem:[#allocation2 + $0x130] sm:$0xf0] %v330_v38  ;;  %v298_v50 = vmul.f32 %v290_v46, %v1350_v10  ;;  %v287_v10 = vperm.slane %v1390_v0, 0  ;;  %v628_v0 = vld [vmem:[%s1605_s2] sm:$0xff] }
  0x72   : > { %782 = vmatpush.msra.mxu2 %v649_v34  ;;  %v650_v42 = vld [vmem:[#allocation2 + $0x140] sm:$0xff]  ;;  %754 = vmatpush.msra.mxu1 %v429_v12  ;;  %351 = vst [vmem:[#allocation2 + $0x48] sm:$0xf0] %v331_v43  ;;  %v360_v52 = vmul.f32 %v356_v33, %v1352_v14  ;;  %v361_v4 = vmul.f32 %v357_v41, %v1361_v23  ;;  %v288_v57 = vperm.slane %v1395_v7, 0 }
  0x73   : > { %808 = vmatpush.msra.mxu3 %v650_v42  ;;  %729 = vmatpush.msra.mxu0 %v401_v27  ;;  %372 = vst [vmem:[#allocation2 + $0xe0] sm:$0xf] %v364_v48  ;;  %v293_v54 = vmul.f32 %v289_v44, %v1341_v3  ;;  %v294_v56 = vmul.f32 %v290_v46, %v1348_v9 }
  0x74   : > { %783 = vmatpush.msra.mxu2 %v362_v17  ;;  %755 = vmatpush.msra.mxu1 %v403_v37  ;;  %373 = vst [vmem:[#allocation2 + $0x188] sm:$0xf] %v365_v49  ;;  %v295_v62 = vmul.f32 %v287_v10, %v1355_v18  ;;  %v296_v3 = vmul.f32 %v288_v57, %v1367_v28  ;;  %v692_v28 = vld [vmem:[%s1606_s3 + $0x8] sm:$0xff] }
  0x75   : > { %809 = vmatpush.msra.mxu3 %v363_v20  ;;  %1037 = vset.pattern.permute.xlu0 %v1174_v51  ;;  %305 = vst [vmem:[#allocation2 + $0x130] sm:$0xf] %v297_v35  ;;  %v291_v18 = vmul.f32 %v287_v10, %v1352_v14  ;;  %v292_v7 = vmul.f32 %v288_v57, %v1361_v23  ;;  %v630_v23 = vld [vmem:[%s1605_s2 + $0x10] sm:$0xff] }
  0x76   : > { %784 = vmatpush.msra.mxu2 %v337_v45  ;;  %1038 = vset.pattern.permute.xlu1 %v1174_v51  ;;  %306 = vst [vmem:[#allocation2 + $0x48] sm:$0xf] %v298_v50 }
  0x77   : > { %810 = vmatpush.msra.mxu3 %v339_v47  ;;  %696 = vperm.xlu0 %1037, %v691_v36   ;;  %303 = vst [vmem:[#allocation2 + $0x50] sm:$0xf] %v295_v62 }
  0x78   : > { %706 = vperm.xlu1 %1038, %v693_v63   ;;  %304 = vst [vmem:[#allocation2 + $0x168] sm:$0xf] %v296_v3 }
  0x7a   : > { %v647_v58 = vld [vmem:[#allocation2 + $0xe0] sm:$0xff] }
  0x7b   : > { %730 = vmatpush.msra.mxu0 %v647_v58  ;;  %v648_v59 = vld [vmem:[#allocation2 + $0x188] sm:$0xff] }
  0x7c   : > { %756 = vmatpush.msra.mxu1 %v648_v59  ;;  %v637_v1 = vld [vmem:[#allocation2 + $0x130] sm:$0xff] }
  0x7d   : > { %785 = vmatpush.msra.mxu2 %v637_v1  ;;  %v638_v9 = vld [vmem:[#allocation2 + $0x48] sm:$0xff]  ;;  %731 = vmatpush.msra.mxu0 %v360_v52 }
  0x7e   : > { %811 = vmatpush.msra.mxu3 %v638_v9  ;;  %757 = vmatpush.msra.mxu1 %v361_v4  ;;  %v635_v14 = vld [vmem:[#allocation2 + $0x50] sm:$0xff] }
  0x7f   : > { %786 = vmatpush.msra.mxu2 %v293_v54  ;;  %732 = vmatpush.msra.mxu0 %v1473_v60  ;;  %v636_v40 = vld [vmem:[#allocation2 + $0x168] sm:$0xff] }
  0x80   : > { %812 = vmatpush.msra.mxu3 %v294_v56  ;;  %965 = vmatmul.msk.f32.vlgmr.msra.gmra.mxu2 %vm709_vm1, %v628_v0 }
  0x81   : > { %968 = vmatmul.msk.f32.vlgmr.msra.gmra.mxu3 %vm709_vm1, %v628_v0  ;;  %758 = vmatpush.msra.mxu1 %v1478_v61 }
  0x82   : > { %701 = vperm.xlu0 %1037, %v692_v28   ;;  %733 = vmatpush.msra.mxu0 %v635_v14 }
  0x83   : > { %759 = vmatpush.msra.mxu1 %v636_v40 }
  0x84   : > { %734 = vmatpush.msra.mxu0 %v291_v18 }
  0x85   : > { %760 = vmatpush.msra.mxu1 %v292_v7  ;;  %959 = vmatmul.msk.f32.vlgmr.msra.gmra.mxu0 %vm709_vm1, %v628_v0 }
  0x86   : > { %962 = vmatmul.msk.f32.vlgmr.msra.gmra.mxu1 %vm709_vm1, %v628_v0 }
  0x88   : > { %966 = vmatmul.msk.f32.gmra.mxu2 %vm709_vm1, %v629_v39 }
  0x89   : > { %969 = vmatmul.msk.f32.gmra.mxu3 %vm709_vm1, %v629_v39 }
  0x8d   : > { %960 = vmatmul.msk.f32.gmra.mxu0 %vm709_vm1, %v629_v39 }
  0x8e   : > { %963 = vmatmul.msk.f32.gmra.mxu1 %vm709_vm1, %v629_v39 }
  0x90   : > { %967 = vmatmul.msk.f32.gmra.mxu2 %vm709_vm1, %v630_v23 }
  0x91   : > { %970 = vmatmul.msk.f32.gmra.mxu3 %vm709_vm1, %v630_v23 }
  0x95   : > { %961 = vmatmul.msk.f32.gmra.mxu0 %vm709_vm1, %v630_v23 }
  0x96   : > { %964 = vmatmul.msk.f32.gmra.mxu1 %vm709_vm1, %v630_v23 }
  0xe9   : > { %v697_v53 = vpop.permute.xlu0 %696 }
  0xea   : > { %v707_v24 = vpop.permute.xlu1 %706 }
  0xf4   : > { %v702_v12 = vpop.permute.xlu0 %701 }
 0x102   : > { %v736_v5 = vpop.f32.mrf.mxu0 }
 0x103   : > { %v788_v55 = vpop.f32.mrf.mxu2  ;;  %v737_v6 = vadd.f32 %v736_v5, %v697_v53  ;;  %v762_v8 = vpop.f32.mrf.mxu1 }
 0x104   : > { %v789_v60 = vadd.f32 %v788_v55, %v697_v53  ;;  %v814_v61 = vpop.f32.mrf.mxu3  ;;  %v763_v11 = vadd.f32 %v762_v8, %v697_v53 }
 0x105   : > { %v815_v2 = vadd.f32 %v814_v61, %v697_v53  ;;  %823 = vst [vmem:[%s1555_s20] sm:$0xff] %v737_v6 }
 0x106   : > { %825 = vst [vmem:[%s1555_s20 + $0x10] sm:$0xff] %v789_v60 }
 0x107   : > { %826 = vst [vmem:[%s1555_s20 + $0x18] sm:$0xff] %v815_v2 }
 0x108   : > { %824 = vst [vmem:[%s1555_s20 + $0x8] sm:$0xff] %v763_v11 }
 0x10a   : > { %v739_v19 = vpop.f32.mrf.mxu0 }
 0x10b   : > { %v791_v13 = vpop.f32.mrf.mxu2  ;;  %v740_v20 = vadd.f32 %v739_v19, %v702_v12  ;;  %v765_v21 = vpop.f32.mrf.mxu1 }
 0x10c   : > { %v792_v15 = vadd.f32 %v791_v13, %v702_v12  ;;  %v817_v16 = vpop.f32.mrf.mxu3  ;;  %v766_v22 = vadd.f32 %v765_v21, %v702_v12 }
 0x10d   : > { %v818_v17 = vadd.f32 %v817_v16, %v702_v12  ;;  %827 = vst [vmem:[%s1555_s20 + $0x20] sm:$0xff] %v740_v20 }
 0x10e   : > { %829 = vst [vmem:[%s1555_s20 + $0x30] sm:$0xff] %v792_v15 }
 0x10f   : > { %830 = vst [vmem:[%s1555_s20 + $0x38] sm:$0xff] %v818_v17 }
 0x110   : > { %828 = vst [vmem:[%s1555_s20 + $0x28] sm:$0xff] %v766_v22 }
 0x112   : > { %v742_v30 = vpop.f32.mrf.mxu0 }
 0x113   : > { %v794_v25 = vpop.f32.mrf.mxu2  ;;  %v743_v31 = vadd.f32 %v742_v30, %v707_v24  ;;  %v768_v32 = vpop.f32.mrf.mxu1 }
 0x114   : > { %v795_v26 = vadd.f32 %v794_v25, %v707_v24  ;;  %v820_v27 = vpop.f32.mrf.mxu3  ;;  %v769_v33 = vadd.f32 %v768_v32, %v707_v24 }
 0x115   : > { %v821_v29 = vadd.f32 %v820_v27, %v707_v24  ;;  %831 = vst [vmem:[%s1555_s20 + $0x40] sm:$0xff] %v743_v31 }
 0x116   : > { %833 = vst [vmem:[%s1555_s20 + $0x50] sm:$0xff] %v795_v26 }
 0x117   : > { %834 = vst [vmem:[%s1555_s20 + $0x58] sm:$0xff] %v821_v29 }
 0x118   : > { %832 = vst [vmem:[%s1555_s20 + $0x48] sm:$0xff] %v769_v33 }
 0x119   : > { %1126 = shalt.err (!%p1123_p7)
}
 0x11a   : > { %s1175_s29 = smov 512   ;;  %s1176_s9 = smov 1024  }
 0x11b   : > { %s1177_s30 = smov 32  }
 0x11c   : > { %983 = dma.vmem_to_hbm [thread:$0]  (%p1253_p11), %s849_s24, 1536, %s851_s19, %s836_s26, %s1175_s29, %s1176_s9, %s1177_s30  }
 0x11d PF: > { %s865_s11 = sand.u32 1, %s1157_s15   ;;  %p993_p0 = pnand %p949_p9, %p1257_p12 }
 0x11e   : > { %s866_s13 = scalar_lea.sflag [#allocation5], %s865_s11 }
 0x11f   : > { %p994_p8 = pneg %p993_p0 }
 0x121   : > { %1152 = dma.done.wait (%p994_p8), %s866_s13, 1536  }
 0x122   : > { %1154 = vsyncadd (%p994_p8), %s866_s13, 4294965760  ;;  %s1621_s14 = sld [smem:[#allocation12_spill]]  ;;  %p20_p10 = scmp.ge.s32.totalorder %s1228_s21, 4  }
 0x123   : > { %s1622_s17 = sld [smem:[#allocation13_spill]]  ;;  %s1623_s15 = smov %s1161_s16 }
 0x124   : > { %s1625_s18 = smov %s1228_s21  ;;  %22 = sbr.rel (!%p20_p10) target bundleno = 9 (0x9), region = 94 }
 0x128   : > { %s1624_s16 = smov %s1621_s14 }
 0x129   :  { %872 = vsyncpa [#allocation4], 1 }
 0x12a   :  { %874 = vsyncpa [#allocation4 + $0x1], 1 }
 0x12b   :  { %875 = vsyncpa [#allocation7], 1 }
 0x12c   :  { %877 = vsyncpa [#allocation7 + $0x1], 1 }
 0x12d   :  { %878 = vsyncpa [#allocation5], 1 }
 0x12e   :  { %880 = vsyncpa [#allocation5 + $0x1], 1 }

</bundles_post_ra>
